<compile_context>
chip_gen: v7x
topology: tpu7x:2x2x1
jax: 0.10.0
libtpu: 0.0.40
codegen_flags: <defaults>
</compile_context>

<pallas_src>
import functools
import math

import jax
import jax.numpy as jnp
from jax.experimental import pallas as pl
from jax.experimental.pallas import tpu as pltpu

LN_EPS = 1e-5  # torch.nn.LayerNorm default


def _layernorm_over_features(x):
    """LayerNorm (no affine) over the feature axis = axis 0 of [F, N]."""
    mu = jnp.mean(x, axis=0, keepdims=True)
    xc = x - mu
    var = jnp.mean(xc * xc, axis=0, keepdims=True)
    return xc * jax.lax.rsqrt(var + LN_EPS)


def _mlp_kernel(x_ref, w1_ref, b1_ref, w2_ref, b2_ref, wo_ref, bo_ref, o_ref):
    # x_ref: [batch_tile, D_in] batch-major (no wrapper transpose).
    # Weights in native PyTorch orientation [out, in]; biases [out, 1].
    x = x_ref[...].astype(jnp.float32)

    # hidden layer 1: Linear -> LayerNorm(no affine) -> ReLU -> Dropout(eval=id)
    # Contract W1[in] x X[in]: result is feature-major [H1, batch_tile] with
    # the batch on the 128-lane axis (all later VPU/XLU work is lane-dense).
    h = jax.lax.dot_general(
        w1_ref[...], x, (((1,), (1,)), ((), ())),
        preferred_element_type=jnp.float32) + b1_ref[...]
    h = _layernorm_over_features(h)
    h = jnp.maximum(h, 0.0)

    # hidden layer 2: Linear -> LayerNorm(no affine) -> ReLU -> Dropout(eval=id)
    h = jnp.dot(w2_ref[...], h, preferred_element_type=jnp.float32) + b2_ref[...]
    h = _layernorm_over_features(h)
    h = jnp.maximum(h, 0.0)

    # output Linear + output LayerNorm (elementwise_affine=False)
    y = jnp.dot(wo_ref[...], h, preferred_element_type=jnp.float32) + bo_ref[...]
    y = _layernorm_over_features(y)

    o_ref[...] = y.astype(o_ref.dtype)  # lane-dense [C, batch_tile] store


@functools.partial(jax.jit, static_argnames=("batch_tile", "feature_major_out"))
def noisy_inference_network_fwd(x, w1, b1, w2, b2, wo, bo,
                                batch_tile=2048, feature_major_out=False):
    """x: [B, D_in]; weights in PyTorch orientation [out, in]; biases [out]."""
    B, D_in = x.shape
    H1 = w1.shape[0]
    H2 = w2.shape[0]
    C = wo.shape[0]

    # Lane-align the batch axis.  Only pads when B % 128 != 0 (<=127 rows),
    # not a full batch_tile alignment -- usually a no-op.
    Bp = ((B + 127) // 128) * 128
    xb = x if Bp == B else jnp.pad(x, ((0, Bp - B), (0, 0)))

    # Largest multiple-of-128 tile <= batch_tile that divides Bp (no pad to
    # the tile size needed; fewer, bigger steps amortize the ~0.35us/step
    # overhead; caller can pick batch_tile for an even step count on v7x).
    tile = math.gcd(Bp, max(128, (batch_tile // 128) * 128))
    grid = (Bp // tile,)

    b1c = b1.reshape(H1, 1)
    b2c = b2.reshape(H2, 1)
    boc = bo.reshape(C, 1)

    full = lambda shape: pl.BlockSpec(shape, lambda i: (0, 0))  # resident consts

    out_t = pl.pallas_call(
        _mlp_kernel,
        out_shape=jax.ShapeDtypeStruct((C, Bp), jnp.float32),
        grid_spec=pltpu.PrefetchScalarGridSpec(
            num_scalar_prefetch=0,
            grid=grid,
            in_specs=[
                pl.BlockSpec((tile, D_in), lambda i: (i, 0)),  # x, batch-major
                full((H1, D_in)),   # W1
                full((H1, 1)),      # b1
                full((H2, H1)),     # W2
                full((H2, 1)),      # b2
                full((C, H2)),      # Wo
                full((C, 1)),       # bo
            ],
            out_specs=pl.BlockSpec((C, tile), lambda i: (0, i)),
        ),
        compiler_params=pltpu.CompilerParams(
            dimension_semantics=("parallel",)),
    )(xb, w1, b1c, w2, b2c, wo, boc)

    if feature_major_out:
        return out_t[:, :B]          # [C, B]: skip the output transpose entirely
    return out_t[:, :B].T            # module convention [B, C] (fused in-jit)


def reference_fwd(x, w1, b1, w2, b2, wo, bo):
    def ln(v):
        mu = jnp.mean(v, axis=-1, keepdims=True)
        vc = v - mu
        var = jnp.mean(vc * vc, axis=-1, keepdims=True)
        return vc * jax.lax.rsqrt(var + LN_EPS)

    x = x.astype(jnp.float32)
    h = x @ w1.T + b1
    h = jnp.maximum(ln(h), 0.0)
    h = h @ w2.T + b2
    h = jnp.maximum(ln(h), 0.0)
    y = h @ wo.T + bo
    return ln(y)


if __name__ == "__main__":
    # Synthetic "model_config": hiddens=[32, 32], n_components=8,
    # activation=ReLU, frozen_embeddings=True, output_normalization='layer',
    # affine=False, inference_dropout (inactive in eval).
    B, D_IN, H1, H2, C = 512, 16, 32, 32, 8
    BATCH_TILE = 256  # 2 grid steps at B=512: keeps both v7x TCs busy

    key = jax.random.PRNGKey(0)
    ks = jax.random.split(key, 8)

    # Deterministic parameter init (PyTorch-Linear-style uniform bounds),
    # weights in PyTorch orientation [out_features, in_features].
    def init_linear(kw, kb, fan_in, fan_out):
        bound = 1.0 / (fan_in ** 0.5)
        w = jax.random.uniform(kw, (fan_out, fan_in), jnp.float32, -bound, bound)
        b = jax.random.uniform(kb, (fan_out,), jnp.float32, -bound, bound)
        return w, b

    w1, b1 = init_linear(ks[0], ks[1], D_IN, H1)
    w2, b2 = init_linear(ks[2], ks[3], H1, H2)
    wo, bo = init_linear(ks[4], ks[5], H2, C)

    x = jax.random.normal(ks[6], (B, D_IN), jnp.float32)

    out = noisy_inference_network_fwd(x, w1, b1, w2, b2, wo, bo,
                                      batch_tile=BATCH_TILE)
    out = jax.block_until_ready(out)

    ref = reference_fwd(x, w1, b1, w2, b2, wo, bo)
    assert out.shape == (B, C)
    assert jnp.allclose(out, ref, atol=1e-4, rtol=1e-4), "mismatch vs reference"

    print("KERNEL_OK")
</pallas_src>

<mosaic_0001>
module attributes {stable_mosaic.version = 11 : i64} {
  func.func @_mlp_kernel(%arg0: i32, %arg1: memref<256x16xf32, #tpu.memory_space<vmem>>, %arg2: memref<32x16xf32, #tpu.memory_space<vmem>>, %arg3: memref<32x1xf32, #tpu.memory_space<vmem>>, %arg4: memref<32x32xf32, #tpu.memory_space<vmem>>, %arg5: memref<32x1xf32, #tpu.memory_space<vmem>>, %arg6: memref<8x32xf32, #tpu.memory_space<vmem>>, %arg7: memref<8x1xf32, #tpu.memory_space<vmem>>, %arg8: memref<8x256xf32, #tpu.memory_space<vmem>>) attributes {dimension_semantics = [#tpu.dimension_semantics<parallel>], iteration_bounds = array<i64: 2>, scalar_prefetch = 0 : i64, scratch_operands = 0 : i64, tpu.core_type = #tpu.core_type<tc>, window_params = [{transform_indices = @transform_0, window_bounds = array<i64: 256, 16>}, {pipeline_mode = #tpu.pipeline_mode<synchronous>, transform_indices = @transform_1, window_bounds = array<i64: 32, 16>}, {pipeline_mode = #tpu.pipeline_mode<synchronous>, transform_indices = @transform_2, window_bounds = array<i64: 32, 1>}, {pipeline_mode = #tpu.pipeline_mode<synchronous>, transform_indices = @transform_3, window_bounds = array<i64: 32, 32>}, {pipeline_mode = #tpu.pipeline_mode<synchronous>, transform_indices = @transform_4, window_bounds = array<i64: 32, 1>}, {pipeline_mode = #tpu.pipeline_mode<synchronous>, transform_indices = @transform_5, window_bounds = array<i64: 8, 32>}, {pipeline_mode = #tpu.pipeline_mode<synchronous>, transform_indices = @transform_6, window_bounds = array<i64: 8, 1>}, {transform_indices = @transform_7, window_bounds = array<i64: 8, 256>}]} {
    %c0 = arith.constant 0 : index
    %c0_0 = arith.constant 0 : index
    %0 = vector.load %arg1[%c0, %c0_0] : memref<256x16xf32, #tpu.memory_space<vmem>>, vector<256x16xf32>
    %c0_1 = arith.constant 0 : index
    %c0_2 = arith.constant 0 : index
    %1 = vector.load %arg2[%c0_1, %c0_2] : memref<32x16xf32, #tpu.memory_space<vmem>>, vector<32x16xf32>
    %cst = arith.constant dense<0.000000e+00> : vector<32x256xf32>
    %2 = tpu.matmul %1, %0, %cst {dimension_numbers = #tpu.dot_dimension_numbers<[1], [1], [0], [0], [0, 0, 1, 0], [], []>} : vector<32x16xf32>, vector<256x16xf32>, vector<32x256xf32> -> vector<32x256xf32>
    %c0_3 = arith.constant 0 : index
    %c0_4 = arith.constant 0 : index
    %3 = vector.load %arg3[%c0_3, %c0_4] : memref<32x1xf32, #tpu.memory_space<vmem>>, vector<32x1xf32>
    %4 = vector.broadcast %3 : vector<32x1xf32> to vector<32x256xf32>
    %5 = arith.addf %2, %4 : vector<32x256xf32>
    %cst_5 = arith.constant dense<0.000000e+00> : vector<256xf32>
    %6 = vector.multi_reduction <add>, %5, %cst_5 [0] : vector<32x256xf32> to vector<256xf32>
    %7 = vector.shape_cast %6 : vector<256xf32> to vector<1x256xf32>
    %cst_6 = arith.constant 3.200000e+01 : f32
    %8 = vector.broadcast %cst_6 : f32 to vector<1x256xf32>
    %9 = arith.divf %7, %8 : vector<1x256xf32>
    %10 = vector.broadcast %9 : vector<1x256xf32> to vector<32x256xf32>
    %11 = arith.subf %5, %10 : vector<32x256xf32>
    %12 = arith.mulf %11, %11 : vector<32x256xf32>
    %cst_7 = arith.constant dense<0.000000e+00> : vector<256xf32>
    %13 = vector.multi_reduction <add>, %12, %cst_7 [0] : vector<32x256xf32> to vector<256xf32>
    %14 = vector.shape_cast %13 : vector<256xf32> to vector<1x256xf32>
    %cst_8 = arith.constant 3.200000e+01 : f32
    %15 = vector.broadcast %cst_8 : f32 to vector<1x256xf32>
    %16 = arith.divf %14, %15 : vector<1x256xf32>
    %cst_9 = arith.constant 9.99999974E-6 : f32
    %17 = vector.broadcast %cst_9 : f32 to vector<1x256xf32>
    %18 = arith.addf %16, %17 : vector<1x256xf32>
    %19 = math.rsqrt %18 : vector<1x256xf32>
    %20 = vector.broadcast %19 : vector<1x256xf32> to vector<32x256xf32>
    %21 = arith.mulf %11, %20 : vector<32x256xf32>
    %cst_10 = arith.constant 0.000000e+00 : f32
    %22 = vector.broadcast %cst_10 : f32 to vector<32x256xf32>
    %23 = arith.maximumf %21, %22 : vector<32x256xf32>
    %c0_11 = arith.constant 0 : index
    %c0_12 = arith.constant 0 : index
    %24 = vector.load %arg4[%c0_11, %c0_12] : memref<32x32xf32, #tpu.memory_space<vmem>>, vector<32x32xf32>
    %cst_13 = arith.constant dense<0.000000e+00> : vector<32x256xf32>
    %25 = tpu.matmul %24, %23, %cst_13 {dimension_numbers = #tpu.dot_dimension_numbers<[1], [0], [0], [1], [0, 0, 1, 1], [], []>} : vector<32x32xf32>, vector<32x256xf32>, vector<32x256xf32> -> vector<32x256xf32>
    %c0_14 = arith.constant 0 : index
    %c0_15 = arith.constant 0 : index
    %26 = vector.load %arg5[%c0_14, %c0_15] : memref<32x1xf32, #tpu.memory_space<vmem>>, vector<32x1xf32>
    %27 = vector.broadcast %26 : vector<32x1xf32> to vector<32x256xf32>
    %28 = arith.addf %25, %27 : vector<32x256xf32>
    %cst_16 = arith.constant dense<0.000000e+00> : vector<256xf32>
    %29 = vector.multi_reduction <add>, %28, %cst_16 [0] : vector<32x256xf32> to vector<256xf32>
    %30 = vector.shape_cast %29 : vector<256xf32> to vector<1x256xf32>
    %cst_17 = arith.constant 3.200000e+01 : f32
    %31 = vector.broadcast %cst_17 : f32 to vector<1x256xf32>
    %32 = arith.divf %30, %31 : vector<1x256xf32>
    %33 = vector.broadcast %32 : vector<1x256xf32> to vector<32x256xf32>
    %34 = arith.subf %28, %33 : vector<32x256xf32>
    %35 = arith.mulf %34, %34 : vector<32x256xf32>
    %cst_18 = arith.constant dense<0.000000e+00> : vector<256xf32>
    %36 = vector.multi_reduction <add>, %35, %cst_18 [0] : vector<32x256xf32> to vector<256xf32>
    %37 = vector.shape_cast %36 : vector<256xf32> to vector<1x256xf32>
    %cst_19 = arith.constant 3.200000e+01 : f32
    %38 = vector.broadcast %cst_19 : f32 to vector<1x256xf32>
    %39 = arith.divf %37, %38 : vector<1x256xf32>
    %cst_20 = arith.constant 9.99999974E-6 : f32
    %40 = vector.broadcast %cst_20 : f32 to vector<1x256xf32>
    %41 = arith.addf %39, %40 : vector<1x256xf32>
    %42 = math.rsqrt %41 : vector<1x256xf32>
    %43 = vector.broadcast %42 : vector<1x256xf32> to vector<32x256xf32>
    %44 = arith.mulf %34, %43 : vector<32x256xf32>
    %cst_21 = arith.constant 0.000000e+00 : f32
    %45 = vector.broadcast %cst_21 : f32 to vector<32x256xf32>
    %46 = arith.maximumf %44, %45 : vector<32x256xf32>
    %c0_22 = arith.constant 0 : index
    %c0_23 = arith.constant 0 : index
    %47 = vector.load %arg6[%c0_22, %c0_23] : memref<8x32xf32, #tpu.memory_space<vmem>>, vector<8x32xf32>
    %cst_24 = arith.constant dense<0.000000e+00> : vector<8x256xf32>
    %48 = tpu.matmul %47, %46, %cst_24 {dimension_numbers = #tpu.dot_dimension_numbers<[1], [0], [0], [1], [0, 0, 1, 1], [], []>} : vector<8x32xf32>, vector<32x256xf32>, vector<8x256xf32> -> vector<8x256xf32>
    %c0_25 = arith.constant 0 : index
    %c0_26 = arith.constant 0 : index
    %49 = vector.load %arg7[%c0_25, %c0_26] : memref<8x1xf32, #tpu.memory_space<vmem>>, vector<8x1xf32>
    %50 = vector.broadcast %49 : vector<8x1xf32> to vector<8x256xf32>
    %51 = arith.addf %48, %50 : vector<8x256xf32>
    %cst_27 = arith.constant dense<0.000000e+00> : vector<256xf32>
    %52 = vector.multi_reduction <add>, %51, %cst_27 [0] : vector<8x256xf32> to vector<256xf32>
    %53 = vector.shape_cast %52 : vector<256xf32> to vector<1x256xf32>
    %cst_28 = arith.constant 8.000000e+00 : f32
    %54 = vector.broadcast %cst_28 : f32 to vector<1x256xf32>
    %55 = arith.divf %53, %54 : vector<1x256xf32>
    %56 = vector.broadcast %55 : vector<1x256xf32> to vector<8x256xf32>
    %57 = arith.subf %51, %56 : vector<8x256xf32>
    %58 = arith.mulf %57, %57 : vector<8x256xf32>
    %cst_29 = arith.constant dense<0.000000e+00> : vector<256xf32>
    %59 = vector.multi_reduction <add>, %58, %cst_29 [0] : vector<8x256xf32> to vector<256xf32>
    %60 = vector.shape_cast %59 : vector<256xf32> to vector<1x256xf32>
    %cst_30 = arith.constant 8.000000e+00 : f32
    %61 = vector.broadcast %cst_30 : f32 to vector<1x256xf32>
    %62 = arith.divf %60, %61 : vector<1x256xf32>
    %cst_31 = arith.constant 9.99999974E-6 : f32
    %63 = vector.broadcast %cst_31 : f32 to vector<1x256xf32>
    %64 = arith.addf %62, %63 : vector<1x256xf32>
    %65 = math.rsqrt %64 : vector<1x256xf32>
    %66 = vector.broadcast %65 : vector<1x256xf32> to vector<8x256xf32>
    %67 = arith.mulf %57, %66 : vector<8x256xf32>
    %c0_32 = arith.constant 0 : index
    %c0_33 = arith.constant 0 : index
    %68 = vector.load %arg8[%c0_32, %c0_33] : memref<8x256xf32, #tpu.memory_space<vmem>>, vector<8x256xf32>
    tpu.vector_store %arg8[%c0_32, %c0_33], %67 {strides = array<i32>} : memref<8x256xf32, #tpu.memory_space<vmem>>, vector<8x256xf32>,
    return
  }
  func.func @transform_0(%arg0: i32) -> (i32, i32) {
    %c0_i32 = arith.constant 0 : i32
    %c0_i32_0 = arith.constant 0 : i32
    return %arg0, %c0_i32 : i32, i32
  }
  func.func @transform_1(%arg0: i32) -> (i32, i32) {
    %c0_i32 = arith.constant 0 : i32
    %c0_i32_0 = arith.constant 0 : i32
    %c0_i32_1 = arith.constant 0 : i32
    return %c0_i32, %c0_i32_0 : i32, i32
  }
  func.func @transform_2(%arg0: i32) -> (i32, i32) {
    %c0_i32 = arith.constant 0 : i32
    %c0_i32_0 = arith.constant 0 : i32
    %c0_i32_1 = arith.constant 0 : i32
    return %c0_i32, %c0_i32_0 : i32, i32
  }
  func.func @transform_3(%arg0: i32) -> (i32, i32) {
    %c0_i32 = arith.constant 0 : i32
    %c0_i32_0 = arith.constant 0 : i32
    %c0_i32_1 = arith.constant 0 : i32
    return %c0_i32, %c0_i32_0 : i32, i32
  }
  func.func @transform_4(%arg0: i32) -> (i32, i32) {
    %c0_i32 = arith.constant 0 : i32
    %c0_i32_0 = arith.constant 0 : i32
    %c0_i32_1 = arith.constant 0 : i32
    return %c0_i32, %c0_i32_0 : i32, i32
  }
  func.func @transform_5(%arg0: i32) -> (i32, i32) {
    %c0_i32 = arith.constant 0 : i32
    %c0_i32_0 = arith.constant 0 : i32
    %c0_i32_1 = arith.constant 0 : i32
    return %c0_i32, %c0_i32_0 : i32, i32
  }
  func.func @transform_6(%arg0: i32) -> (i32, i32) {
    %c0_i32 = arith.constant 0 : i32
    %c0_i32_0 = arith.constant 0 : i32
    %c0_i32_1 = arith.constant 0 : i32
    return %c0_i32, %c0_i32_0 : i32, i32
  }
  func.func @transform_7(%arg0: i32) -> (i32, i32) {
    %c0_i32 = arith.constant 0 : i32
    %c0_i32_0 = arith.constant 0 : i32
    return %c0_i32, %arg0 : i32, i32
  }
}

</mosaic_0001>

<bundles_post_ra>
// kernel: noisy_inference_network_fwd.1
= control target key start
LH: loop header
LB: loop body
LE: loop exit
PB: predicated region body
PF: predicated region fallthrough
CT: control target
= control target key end

     0   :  { %12 = vsyncpa [#allocation3], 0  ;;  %s1584_s0 = inlined_call_operand.vmem [shape: f32[512,16], index: 0, kind: input, shape index: {}]   ;;  %s1585_s1 = inlined_call_operand.vmem [shape: f32[32,16], index: 1, kind: input, shape index: {}]   ;;  %s1586_s2 = inlined_call_operand.vmem [shape: f32[32,1], index: 2, kind: input, shape index: {}]   ;;  %s1587_s3 = inlined_call_operand.vmem [shape: f32[32,32], index: 3, kind: input, shape index: {}]   ;;  %s1588_s4 = inlined_call_operand.vmem [shape: f32[32,1], index: 4, kind: input, shape index: {}]   ;;  %s1589_s5 = inlined_call_operand.vmem [shape: f32[8,32], index: 5, kind: input, shape index: {}]   ;;  %s1590_s6 = inlined_call_operand.vmem [shape: f32[8,1], index: 6, kind: input, shape index: {}]   ;;  %s1591_s7 = inlined_call_operand.hbm [shape: f32[8,512], index: 7, kind: output, shape index: {}]  }
   0x1   :  { %14 = vsyncpa [#allocation3 + $0x1], 0  ;;  %s1337_s24 = smov 0   ;;  %s1339_s25 = smov 0  }
   0x2   :  { %s1341_s26 = smov 0   ;;  %s1343_s27 = smov 0  }
   0x3 LB: > { %s1358_s28 = sadd.s32 4294967295, %s1292_s27   ;;  %s1017_s29 = sadd.s32 4294967294, %s1292_s27   ;;  %s1292_s27 = sphi %s1343_s27, %s1599_s27   ;;  %s1288_s26 = sphi %s1341_s26, %s1598_s26   ;;  %s1284_s25 = sphi %s1339_s25, %s1597_s25   ;;  %s1280_s24 = sphi %s1337_s24, %s1596_s24  }
   0x4   : > { %s1362_s30 = sadd.s32 1, %s1292_s27   ;;  %s179_s8 = sadd.s32 1, %s1288_s26 }
   0x5   : > { %s176_s9 = ssub.s32 %s1292_s27, %s1362_s30  ;;  %p189_p0 = scmp.ne.s32.totalorder %s1288_s26, %s1284_s25 }
   0x6   : > { %p177_p1 = scmp.eq.s32.totalorder %s176_s9, 0  ;;  %p190_p2 = scmp.eq.s32.totalorder %s1358_s28, 1 }
   0x7   : > { %p195_p3 = scmp.ne.s32.totalorder %s1284_s25, %s1280_s24  ;;  %p196_p4 = scmp.eq.s32.totalorder %s1017_s29, 1 }
   0x8   : > { %s1373_s10 = scalar_select %p177_p1, %s1288_s26, %s179_s8  }
   0x9   : > { %p1375_p5 = por %p190_p2, %p189_p0  ;;  %p1379_p6 = por %p196_p4, %p195_p3 }
   0xa   : > { %p1020_p7 = scmp.ge.s32.totalorder %s1292_s27, 1  ;;  %p241_p8 = scmp.lt.s32.totalorder %s1292_s27, 3 }
   0xc   : > { %p242_p9 = pnand %p1020_p7, %p241_p8 }
   0xd   : > { %s1022_s13 = sshll.u32 (!%p242_p9), %s1358_s28, 5  ;;  %vm340_vm0 = vcmask (!%p242_p9), 130048   ;;  %v1389_v0 = vld [vmem:[%s1585_s1] sm:$0xff] (!%p242_p9)  ;;  %v1294_v1 = vmov (!%p242_p9), 0   ;;  %v318_v3 = vld [vmem:[%s1586_s2 + $0x10] sm:$0xff] (!%p242_p9)  ;;  %v317_v4 = vld [vmem:[%s1586_s2 + $0x8] sm:$0xff] (!%p242_p9) }
   0xe   : > { %245 = sbr.rel (%p242_p9) target bundleno = 955 (0x3bb), region = 48  ;;  %p274_p10 = scmp.lt.s32.totalorder (!%p242_p9), %s1022_s13, 63  ;;  %1103 = vmatprep.mubr.msk.f32.mxu0 (!%p242_p9), %vm340_vm0, %v1389_v0  ;;  %1216 = vset.pattern.permute.xlu0 (!%p242_p9), %v1294_v1  ;;  %v316_v2 = vld [vmem:[%s1586_s2] sm:$0xff] (!%p242_p9)  ;;  %v319_v5 = vld [vmem:[%s1586_s2 + $0x18] sm:$0xff] (!%p242_p9)  ;;  %vm1412_vm1 = vmpackc.low (!%p242_p9), %vm340_vm0, %vm340_vm0  ;;  %v1295_v63 = vmov (!%p242_p9), 0.0   ;;  %vm643_vm2 = vcmask (!%p242_p9), 261120  }
   0xf   : > { %322 = vperm.xlu0 (!%p242_p9), %1216, %v316_v2   ;;  %1217 = vset.pattern.permute.xlu1 (!%p242_p9), %v1294_v1  ;;  %v619_v7 = vld [vmem:[%s1588_s4] sm:$0xff] (!%p242_p9)  ;;  %v620_v8 = vld [vmem:[%s1588_s4 + $0x8] sm:$0xff] (!%p242_p9)  ;;  %v621_v18 = vld [vmem:[%s1588_s4 + $0x10] sm:$0xff] (!%p242_p9)  ;;  %s270_s9 = sand.u32 (!%p242_p9), 1, %s1284_s25   ;;  %s1296_s21 = smov (!%p242_p9), [#allocation2]  }
  0x10   : > { %332 = vperm.xlu1 (!%p242_p9), %1217, %v318_v3   ;;  %v622_v21 = vld [vmem:[%s1588_s4 + $0x18] sm:$0xff] (!%p242_p9)  ;;  %v822_v25 = vld [vmem:[%s1590_s6] sm:$0xff] (!%p242_p9)  ;;  %v313_v60 = vld [vmem:[%s1585_s1 + $0x8] sm:$0xff] (!%p242_p9)  ;;  %720 = vmatprep.mubr.f32.mxu1 (!%p242_p9), %v1295_v63  ;;  %s1021_s15 = sshll.u32 (!%p242_p9), %s270_s9, 4  ;;  %s944_s20 = scalar_lea.sflag (!%p242_p9), [#allocation3], %s270_s9 }
  0x11   : > { %v314_v61 = vld [vmem:[%s1585_s1 + $0x10] sm:$0xff] (!%p242_p9)  ;;  %v315_v62 = vld [vmem:[%s1585_s1 + $0x18] sm:$0xff] (!%p242_p9)  ;;  %s1234_s22 = sshll.u32 (!%p242_p9), %s1296_s21, 4  ;;  %s1235_s22 = int_to_ptr.vmem [resolvable:$false] %s1234_s22 }
  0x12   : > { %s1236_s23 = scalar_lea.vmem (!%p242_p9), %s1235_s22, 512 }
  0x13   : > { %327 = vperm.xlu0 (!%p242_p9), %1216, %v317_v4  }
  0x14   : > { %337 = vperm.xlu1 (!%p242_p9), %1217, %v319_v5  }
  0x15   : > { %s1601_s13 = smov (!%p274_p10, %s1022_s13), 63 }
  0x16   : > { %s1023_s29 = sshll.u32 %s1601_s13, 3  ;;  %s272_s13 = scalar_lea.vmem [#allocation2], %s1021_s15 }
  0x17   : > { %s1408_s14 = scalar_lea.vmem %s1584_s0, %s1023_s29  ;;  %625 = vperm.xlu0 %1216, %v619_v7   ;;  %s958_s16 = sshll.u32 %s272_s13, 4  ;;  %s1544_s16 = int_to_ptr.vmem [resolvable:$true] %s958_s16 }
  0x18   : > { %v296_v9 = vld [vmem:[%s1408_s14 + $0x80] sm:$0xff]  ;;  %v297_v10 = vld [vmem:[%s1408_s14 + $0x88] sm:$0xff]  ;;  %v298_v14 = vld [vmem:[%s1408_s14 + $0x90] sm:$0xff]  ;;  %630 = vperm.xlu1 %1217, %v620_v8   ;;  %p1237_p0 = scmp.lt.s32.totalorder %s1544_s16, %s1235_s22 }
  0x19   : > { %v280_v11 = vld [vmem:[%s1408_s14] sm:$0xff]  ;;  %v1111_v12 = vpack.c.bf16 %v297_v10, %v296_v9  ;;  %v281_v13 = vld [vmem:[%s1408_s14 + $0x8] sm:$0xff]  ;;  %v299_v15 = vld [vmem:[%s1408_s14 + $0x98] sm:$0xff] }
  0x1a   : > { %v1114_v16 = vpack.c.bf16 %v281_v13, %v280_v11  ;;  %v1117_v17 = vpack.c.bf16 %v299_v15, %v298_v14  ;;  %v282_v19 = vld [vmem:[%s1408_s14 + $0x10] sm:$0xff]  ;;  %v283_v20 = vld [vmem:[%s1408_s14 + $0x18] sm:$0xff]  ;;  %v300_v22 = vld [vmem:[%s1408_s14 + $0xa0] sm:$0xff] }
  0x1b   : > { %1113 = vmatprep.subr.msk.bf16.mxu0 %vm1412_vm1, %v1111_v12  ;;  %v301_v23 = vld [vmem:[%s1408_s14 + $0xa8] sm:$0xff]  ;;  %635 = vperm.xlu0 %1216, %v621_v18   ;;  %v1120_v24 = vpack.c.bf16 %v283_v20, %v282_v19  ;;  %v284_v27 = vld [vmem:[%s1408_s14 + $0x20] sm:$0xff]  ;;  %v302_v29 = vld [vmem:[%s1408_s14 + $0xb0] sm:$0xff] }
  0x1c   : > { %1116 = vmatpush3.bf16.xpose.msk.msra.mxu0 %vm1412_vm1, %v1114_v16  ;;  %640 = vperm.xlu1 %1217, %v622_v21   ;;  %v1123_v26 = vpack.c.bf16 %v301_v23, %v300_v22  ;;  %v285_v28 = vld [vmem:[%s1408_s14 + $0x28] sm:$0xff]  ;;  %v303_v30 = vld [vmem:[%s1408_s14 + $0xb8] sm:$0xff]  ;;  %v286_v33 = vld [vmem:[%s1408_s14 + $0x30] sm:$0xff] }
  0x1d   : > { %1119 = vmatprep.subr.msk.bf16.mxu0 %vm1412_vm1, %v1117_v17  ;;  %v1126_v31 = vpack.c.bf16 %v285_v28, %v284_v27  ;;  %v1129_v32 = vpack.c.bf16 %v303_v30, %v302_v29  ;;  %v287_v34 = vld [vmem:[%s1408_s14 + $0x38] sm:$0xff]  ;;  %v304_v35 = vld [vmem:[%s1408_s14 + $0xc0] sm:$0xff]  ;;  %v305_v36 = vld [vmem:[%s1408_s14 + $0xc8] sm:$0xff] }
  0x1e   : > { %v1132_v37 = vpack.c.bf16 %v287_v34, %v286_v33  ;;  %v1135_v38 = vpack.c.bf16 %v305_v36, %v304_v35  ;;  %v288_v39 = vld [vmem:[%s1408_s14 + $0x40] sm:$0xff]  ;;  %v289_v40 = vld [vmem:[%s1408_s14 + $0x48] sm:$0xff]  ;;  %v306_v41 = vld [vmem:[%s1408_s14 + $0xd0] sm:$0xff] }
  0x1f   : > { %825 = vperm.xlu0 %1216, %v822_v25   ;;  %v307_v42 = vld [vmem:[%s1408_s14 + $0xd8] sm:$0xff]  ;;  %v1138_v43 = vpack.c.bf16 %v289_v40, %v288_v39  ;;  %v290_v45 = vld [vmem:[%s1408_s14 + $0x50] sm:$0xff]  ;;  %v308_v47 = vld [vmem:[%s1408_s14 + $0xe0] sm:$0xff] }
  0x20   : > { %v1141_v44 = vpack.c.bf16 %v307_v42, %v306_v41  ;;  %v291_v46 = vld [vmem:[%s1408_s14 + $0x58] sm:$0xff]  ;;  %v309_v48 = vld [vmem:[%s1408_s14 + $0xe8] sm:$0xff]  ;;  %v292_v51 = vld [vmem:[%s1408_s14 + $0x60] sm:$0xff] }
  0x21   : > { %v1144_v49 = vpack.c.bf16 %v291_v46, %v290_v45  ;;  %v1147_v50 = vpack.c.bf16 %v309_v48, %v308_v47  ;;  %v293_v52 = vld [vmem:[%s1408_s14 + $0x68] sm:$0xff]  ;;  %v310_v53 = vld [vmem:[%s1408_s14 + $0xf0] sm:$0xff]  ;;  %v311_v54 = vld [vmem:[%s1408_s14 + $0xf8] sm:$0xff] }
  0x22   : > { %v1150_v55 = vpack.c.bf16 %v293_v52, %v292_v51  ;;  %v1153_v56 = vpack.c.bf16 %v311_v54, %v310_v53  ;;  %v294_v57 = vld [vmem:[%s1408_s14 + $0x70] sm:$0xff]  ;;  %v295_v58 = vld [vmem:[%s1408_s14 + $0x78] sm:$0xff]  ;;  %s1070_s14 = sshll.u32 %s1358_s28, 8  ;;  %s1230_s28 = scalar_lea.vmem %s1544_s16, 256 }
  0x23   : > { %v1156_v59 = vpack.c.bf16 %v295_v58, %v294_v57  ;;  %s1542_s19 = scalar_lea.hbm %s1591_s7, %s1070_s14  ;;  %p1231_p11 = scmp.ne.s32.totalorder %s1544_s16, %s1230_s28 }
  0x24   : > { %1122 = vmatpush3.bf16.xpose.msk.msra.mxu0 %vm1412_vm1, %v1120_v24  ;;  %p1238_p1 = scmp.lt.s32.totalorder %s1236_s23, %s1230_s28 }
  0x25   : > { %1125 = vmatprep.subr.msk.bf16.mxu0 %vm1412_vm1, %v1123_v26  ;;  %p1232_p12 = pnand %p1231_p11, %p1375_p5 }
  0x26   : > { %p1239_p2 = por %p1238_p1, %p1237_p0 }
  0x27   : > { %p1233_p13 = pneg %p1232_p12 }
  0x29   : > { %p1240_p3 = pnand %p1239_p2, %p1233_p13 }
  0x2c   : > { %1128 = vmatpush3.bf16.xpose.msk.msra.mxu0 %vm1412_vm1, %v1126_v31 }
  0x2d   : > { %1131 = vmatprep.subr.msk.bf16.mxu0 %vm1412_vm1, %v1129_v32 }
  0x34   : > { %1134 = vmatpush3.bf16.xpose.msk.msra.mxu0 %vm1412_vm1, %v1132_v37 }
  0x35   : > { %1137 = vmatprep.subr.msk.bf16.mxu0 %vm1412_vm1, %v1135_v38 }
  0x3c   : > { %1140 = vmatpush3.bf16.xpose.msk.msra.mxu0 %vm1412_vm1, %v1138_v43 }
  0x3d   : > { %1143 = vmatprep.subr.msk.bf16.mxu0 %vm1412_vm1, %v1141_v44 }
  0x44   : > { %1146 = vmatpush3.bf16.xpose.msk.msra.mxu0 %vm1412_vm1, %v1144_v49 }
  0x45   : > { %1149 = vmatprep.subr.msk.bf16.mxu0 %vm1412_vm1, %v1147_v50 }
  0x4c   : > { %1152 = vmatpush3.bf16.xpose.msk.msra.mxu0 %vm1412_vm1, %v1150_v55 }
  0x4d   : > { %1155 = vmatprep.subr.msk.bf16.mxu0 %vm1412_vm1, %v1153_v56 }
  0x54   : > { %1158 = vmatpush3.bf16.xpose.msk.msra.mxu0 %vm1412_vm1, %v1156_v59 }
  0x5b   : > { %1104 = vmatmul.mubr.msk.f32.vlgmr.msra.gmra.mrb[0].mxu0 %vm340_vm0, %v1389_v0 }
  0x5c   : > { %1105 = vmatprep.mubr.msk.f32.mxu0 %vm340_vm0, %v313_v60 }
  0x5f   : > { %1106 = vmatmul.mubr.msk.f32.gmra.mrb[2].mxu0 %vm340_vm0, %v313_v60 }
  0x60   : > { %1107 = vmatprep.mubr.msk.f32.mxu0 %vm340_vm0, %v314_v61 }
  0x63   : > { %1108 = vmatmul.mubr.msk.f32.gmra.mrb[4].mxu0 %vm340_vm0, %v314_v61 }
  0x64   : > { %1109 = vmatprep.mubr.msk.f32.mxu0 %vm340_vm0, %v315_v62 }
  0x67   : > { %1110 = vmatmul.mubr.msk.f32.gmra.mrb[6].mxu0 %vm340_vm0, %v315_v62 }
  0x8e   : > { %v323_v0 = vpop.permute.xlu0 %322 }
  0x8f   : > { %v333_v8 = vpop.permute.xlu1 %332 }
  0x92   : > { %v328_v3 = vpop.permute.xlu0 %327 }
  0x93   : > { %v338_v18 = vpop.permute.xlu1 %337 }
 0x12e   : > { %v515_v1 = vpop.f32.mrb[0].mxu0 }
 0x12f   : > { %v517_v2 = vpop.f32.mrb[1].mxu0  ;;  %v516_v5 = vadd.f32 %v515_v1, %v323_v0 }
 0x130   : > { %v518_v9 = vadd.f32 %v517_v2, %v323_v0 }
 0x132   : > { %v521_v4 = vpop.f32.mrb[2].mxu0 }
 0x133   : > { %v522_v6 = vadd.f32 %v521_v4, %v328_v3  ;;  %v523_v7 = vpop.f32.mrb[3].mxu0 }
 0x134   : > { %v524_v10 = vadd.f32 %v523_v7, %v328_v3 }
 0x135   : > { %v538_v11 = vadd.f32 %v522_v6, %v516_v5 }
 0x136   : > { %v547_v12 = vadd.f32 %v524_v10, %v518_v9  ;;  %v527_v13 = vpop.f32.mrb[4].mxu0 }
 0x137   : > { %v528_v14 = vadd.f32 %v527_v13, %v333_v8  ;;  %v529_v15 = vpop.f32.mrb[5].mxu0 }
 0x138   : > { %v530_v16 = vadd.f32 %v529_v15, %v333_v8 }
 0x139   : > { %v539_v17 = vadd.f32 %v538_v11, %v528_v14 }
 0x13a   : > { %v548_v19 = vadd.f32 %v547_v12, %v530_v16  ;;  %v533_v20 = vpop.f32.mrb[6].mxu0 }
 0x13b   : > { %v534_v21 = vadd.f32 %v533_v20, %v338_v18  ;;  %v535_v22 = vpop.f32.mrb[7].mxu0 }
 0x13c   : > { %v536_v23 = vadd.f32 %v535_v22, %v338_v18 }
 0x13d   : > { %v540_v24 = vadd.f32 %v539_v17, %v534_v21 }
 0x13e   : > { %v549_v25 = vadd.f32 %v548_v19, %v536_v23 }
 0x13f   : > { %v541_v26 = vrot.slane %v540_v24, 4 }
 0x140   : > { %v550_v27 = vrot.slane %v549_v25, 4 }
 0x141   : > { %v542_v28 = vadd.f32 %v541_v26, %v540_v24 }
 0x142   : > { %v551_v29 = vadd.f32 %v550_v27, %v549_v25 }
 0x143   : > { %v543_v30 = vrot.slane %v542_v28, 2 }
 0x144   : > { %v552_v31 = vrot.slane %v551_v29, 2 }
 0x145   : > { %v544_v32 = vadd.f32 %v543_v30, %v542_v28 }
 0x146   : > { %v553_v33 = vadd.f32 %v552_v31, %v551_v29 }
 0x147   : > { %v545_v34 = vrot.slane %v544_v32, 1 }
 0x148   : > { %v554_v35 = vrot.slane %v553_v33, 1 }
 0x149   : > { %v546_v36 = vadd.f32 %v545_v34, %v544_v32 }
 0x14a   : > { %v555_v37 = vadd.f32 %v554_v35, %v553_v33 }
 0x14b   : > { %v557_v38 = vmul.f32 0.03125, %v546_v36 }
 0x14c   : > { %v558_v39 = vmul.f32 0.03125, %v555_v37  ;;  %v615_v37 = vld [vmem:[%s1587_s3] sm:$0xff] }
 0x14d   : > { %v559_v40 = vsub.f32 %v516_v5, %v557_v38  ;;  %v561_v41 = vsub.f32 %v522_v6, %v557_v38  ;;  %v563_v42 = vsub.f32 %v528_v14, %v557_v38  ;;  %v565_v43 = vsub.f32 %v534_v21, %v557_v38  ;;  %v616_v38 = vld [vmem:[%s1587_s3 + $0x8] sm:$0xff] }
 0x14e   : > { %v560_v44 = vsub.f32 %v518_v9, %v558_v39  ;;  %v562_v45 = vsub.f32 %v524_v10, %v558_v39  ;;  %v564_v46 = vsub.f32 %v530_v16, %v558_v39  ;;  %v566_v47 = vsub.f32 %v536_v23, %v558_v39  ;;  %v617_v39 = vld [vmem:[%s1587_s3 + $0x10] sm:$0xff] }
 0x14f   : > { %v567_v48 = vmul.f32 %v559_v40, %v559_v40  ;;  %v569_v49 = vmul.f32 %v561_v41, %v561_v41  ;;  %v571_v52 = vmul.f32 %v563_v42, %v563_v42  ;;  %v573_v56 = vmul.f32 %v565_v43, %v565_v43 }
 0x150   : > { %v568_v50 = vmul.f32 %v560_v44, %v560_v44  ;;  %v570_v51 = vmul.f32 %v562_v45, %v562_v45  ;;  %v572_v54 = vmul.f32 %v564_v46, %v564_v46  ;;  %v574_v58 = vmul.f32 %v566_v47, %v566_v47 }
 0x151   : > { %v575_v53 = vadd.f32 %v569_v49, %v567_v48 }
 0x152   : > { %v584_v55 = vadd.f32 %v570_v51, %v568_v50 }
 0x153   : > { %v576_v57 = vadd.f32 %v575_v53, %v571_v52 }
 0x154   : > { %v585_v59 = vadd.f32 %v584_v55, %v572_v54 }
 0x155   : > { %v577_v60 = vadd.f32 %v576_v57, %v573_v56 }
 0x156   : > { %v586_v61 = vadd.f32 %v585_v59, %v574_v58 }
 0x157   : > { %v578_v62 = vrot.slane %v577_v60, 4 }
 0x158   : > { %v587_v0 = vrot.slane %v586_v61, 4 }
 0x159   : > { %v579_v1 = vadd.f32 %v578_v62, %v577_v60 }
 0x15a   : > { %v588_v2 = vadd.f32 %v587_v0, %v586_v61 }
 0x15b   : > { %v580_v3 = vrot.slane %v579_v1, 2 }
 0x15c   : > { %v589_v4 = vrot.slane %v588_v2, 2 }
 0x15d   : > { %v581_v5 = vadd.f32 %v580_v3, %v579_v1 }
 0x15e   : > { %v590_v6 = vadd.f32 %v589_v4, %v588_v2 }
 0x15f   : > { %v582_v7 = vrot.slane %v581_v5, 1 }
 0x160   : > { %v591_v8 = vrot.slane %v590_v6, 1 }
 0x161   : > { %v583_v9 = vadd.f32 %v582_v7, %v581_v5 }
 0x162   : > { %v592_v10 = vadd.f32 %v591_v8, %v590_v6 }
 0x163   : > { %v593_v11 = vmul.f32 0.03125, %v583_v9 }
 0x164   : > { %v594_v12 = vmul.f32 0.03125, %v592_v10 }
 0x165   : > { %v595_v13 = vadd.f32 1e-05, %v593_v11 }
 0x166   : > { %v596_v14 = vadd.f32 1e-05, %v594_v12 }
 0x167   : > { %1218 = vrsqrt.f32 %v595_v13 }
 0x168   : > { %1220 = vrsqrt.f32 %v596_v14 }
 0x171   : > { %v1219_v15 = vpop.eup %1218 }
 0x172   : > { %v1221_v16 = vpop.eup %1220  ;;  %v605_v17 = vmul.f32 %v1219_v15, %v565_v43  ;;  %v599_v18 = vmul.f32 %v1219_v15, %v559_v40  ;;  %v601_v19 = vmul.f32 %v1219_v15, %v561_v41  ;;  %v603_v20 = vmul.f32 %v1219_v15, %v563_v42  ;;  %v618_v40 = vld [vmem:[%s1587_s3 + $0x18] sm:$0xff]  ;;  %v626_v43 = vpop.permute.xlu0 %625 }
 0x173   : > { %v606_v21 = vmul.f32 %v1221_v16, %v566_v47  ;;  %v600_v22 = vmul.f32 %v1221_v16, %v560_v44  ;;  %v602_v23 = vmul.f32 %v1221_v16, %v562_v45  ;;  %v604_v24 = vmul.f32 %v1221_v16, %v564_v46  ;;  %v631_v44 = vpop.permute.xlu1 %630 }
 0x174   : > { %v613_v25 = vmax.f32 %v605_v17, 0.0  ;;  %v607_v26 = vmax.f32 %v599_v18, 0.0  ;;  %v609_v27 = vmax.f32 %v601_v19, 0.0  ;;  %v611_v28 = vmax.f32 %v603_v20, 0.0 }
 0x175   : > { %v614_v29 = vmax.f32 %v606_v21, 0.0  ;;  %v608_v30 = vmax.f32 %v600_v22, 0.0  ;;  %v610_v31 = vmax.f32 %v602_v23, 0.0  ;;  %v612_v32 = vmax.f32 %v604_v24, 0.0 }
 0x176   : > { %v1161_v33 = vpack.c.bf16 %v609_v27, %v607_v26  ;;  %v1165_v34 = vpack.c.bf16 %v613_v25, %v611_v28  ;;  %v636_v52 = vpop.permute.xlu0 %635 }
 0x177   : > { %v1159_v35 = vpack.c.bf16 %v610_v31, %v608_v30  ;;  %v1163_v36 = vpack.c.bf16 %v614_v29, %v612_v32  ;;  %v641_v59 = vpop.permute.xlu1 %640 }
 0x179   : > { %1160 = vmatprep.subr.bf16.mxu1 %v1159_v35 }
 0x17a   : > { %1162 = vmatpush1.bf16.msra.mxu1 %v1161_v33 }
 0x17b   : > { %1164 = vmatprep.subr.bf16.mxu1 %v1163_v36 }
 0x17e   : > { %1166 = vmatpush1.bf16.msra.mxu1 %v1165_v34 }
 0x181   : > { %1060 = vmatmul.mubr.msk.f32.vlgmr.msra.gmra.mrb[0].mxu1 %vm643_vm2, %v615_v37 }
 0x182   : > { %726 = vmatprep.mubr.f32.mxu1 %v1295_v63 }
 0x185   : > { %1061 = vmatmul.mubr.msk.f32.gmra.mrb[2].mxu1 %vm643_vm2, %v616_v38 }
 0x186   : > { %732 = vmatprep.mubr.f32.mxu1 %v1295_v63 }
 0x189   : > { %1062 = vmatmul.mubr.msk.f32.gmra.mrb[4].mxu1 %vm643_vm2, %v617_v39 }
 0x18a   : > { %738 = vmatprep.mubr.f32.mxu1 %v1295_v63 }
 0x18d   : > { %1063 = vmatmul.mubr.msk.f32.gmra.mrb[6].mxu1 %vm643_vm2, %v618_v40 }
 0x18e   : > { %895 = vmatprep.mubr.f32.mxu1 %v1295_v63 }
 0x254   : > { %v722_v41 = vpop.f32.mrb[0].mxu1 }
 0x255   : > { %v724_v42 = vpop.f32.mrb[1].mxu1  ;;  %v723_v46 = vadd.f32 %v722_v41, %v626_v43 }
 0x256   : > { %v725_v49 = vadd.f32 %v724_v42, %v626_v43 }
 0x258   : > { %v728_v45 = vpop.f32.mrb[2].mxu1 }
 0x259   : > { %v729_v47 = vadd.f32 %v728_v45, %v631_v44  ;;  %v730_v48 = vpop.f32.mrb[3].mxu1 }
 0x25a   : > { %v731_v50 = vadd.f32 %v730_v48, %v631_v44 }
 0x25b   : > { %v745_v51 = vadd.f32 %v729_v47, %v723_v46 }
 0x25c   : > { %v754_v53 = vadd.f32 %v731_v50, %v725_v49  ;;  %v734_v54 = vpop.f32.mrb[4].mxu1 }
 0x25d   : > { %v735_v55 = vadd.f32 %v734_v54, %v636_v52  ;;  %v736_v56 = vpop.f32.mrb[5].mxu1 }
 0x25e   : > { %v737_v57 = vadd.f32 %v736_v56, %v636_v52 }
 0x25f   : > { %v746_v58 = vadd.f32 %v745_v51, %v735_v55 }
 0x260   : > { %v755_v63 = vadd.f32 %v754_v53, %v737_v57  ;;  %v740_v60 = vpop.f32.mrb[6].mxu1 }
 0x261   : > { %v741_v61 = vadd.f32 %v740_v60, %v641_v59  ;;  %v742_v62 = vpop.f32.mrb[7].mxu1 }
 0x262   : > { %v743_v0 = vadd.f32 %v742_v62, %v641_v59 }
 0x263   : > { %v747_v1 = vadd.f32 %v746_v58, %v741_v61 }
 0x264   : > { %v756_v2 = vadd.f32 %v755_v63, %v743_v0 }
 0x265   : > { %v748_v3 = vrot.slane %v747_v1, 4 }
 0x266   : > { %v757_v4 = vrot.slane %v756_v2, 4 }
 0x267   : > { %v749_v5 = vadd.f32 %v748_v3, %v747_v1 }
 0x268   : > { %v758_v6 = vadd.f32 %v757_v4, %v756_v2 }
 0x269   : > { %v750_v7 = vrot.slane %v749_v5, 2 }
 0x26a   : > { %v759_v8 = vrot.slane %v758_v6, 2 }
 0x26b   : > { %v751_v9 = vadd.f32 %v750_v7, %v749_v5 }
 0x26c   : > { %v760_v10 = vadd.f32 %v759_v8, %v758_v6 }
 0x26d   : > { %v752_v11 = vrot.slane %v751_v9, 1 }
 0x26e   : > { %v761_v12 = vrot.slane %v760_v10, 1 }
 0x26f   : > { %v753_v13 = vadd.f32 %v752_v11, %v751_v9 }
 0x270   : > { %v762_v14 = vadd.f32 %v761_v12, %v760_v10 }
 0x271   : > { %v763_v15 = vmul.f32 0.03125, %v753_v13  ;;  %v821_v13 = vld [vmem:[%s1589_s5] sm:$0xff] }
 0x272   : > { %v764_v16 = vmul.f32 0.03125, %v762_v14  ;;  %v826_v14 = vpop.permute.xlu0 %825 }
 0x273   : > { %v765_v17 = vsub.f32 %v723_v46, %v763_v15  ;;  %v767_v18 = vsub.f32 %v729_v47, %v763_v15  ;;  %v769_v19 = vsub.f32 %v735_v55, %v763_v15  ;;  %v771_v20 = vsub.f32 %v741_v61, %v763_v15 }
 0x274   : > { %v766_v21 = vsub.f32 %v725_v49, %v764_v16  ;;  %v768_v22 = vsub.f32 %v731_v50, %v764_v16  ;;  %v770_v23 = vsub.f32 %v737_v57, %v764_v16  ;;  %v772_v24 = vsub.f32 %v743_v0, %v764_v16 }
 0x275   : > { %v773_v25 = vmul.f32 %v765_v17, %v765_v17  ;;  %v775_v26 = vmul.f32 %v767_v18, %v767_v18  ;;  %v777_v29 = vmul.f32 %v769_v19, %v769_v19  ;;  %v779_v33 = vmul.f32 %v771_v20, %v771_v20 }
 0x276   : > { %v774_v27 = vmul.f32 %v766_v21, %v766_v21  ;;  %v776_v28 = vmul.f32 %v768_v22, %v768_v22  ;;  %v778_v31 = vmul.f32 %v770_v23, %v770_v23  ;;  %v780_v35 = vmul.f32 %v772_v24, %v772_v24 }
 0x277   : > { %v781_v30 = vadd.f32 %v775_v26, %v773_v25 }
 0x278   : > { %v790_v32 = vadd.f32 %v776_v28, %v774_v27 }
 0x279   : > { %v782_v34 = vadd.f32 %v781_v30, %v777_v29 }
 0x27a   : > { %v791_v36 = vadd.f32 %v790_v32, %v778_v31 }
 0x27b   : > { %v783_v37 = vadd.f32 %v782_v34, %v779_v33 }
 0x27c   : > { %v792_v38 = vadd.f32 %v791_v36, %v780_v35 }
 0x27d   : > { %v784_v39 = vrot.slane %v783_v37, 4 }
 0x27e   : > { %v793_v40 = vrot.slane %v792_v38, 4 }
 0x27f   : > { %v785_v41 = vadd.f32 %v784_v39, %v783_v37 }
 0x280   : > { %v794_v42 = vadd.f32 %v793_v40, %v792_v38 }
 0x281   : > { %v786_v43 = vrot.slane %v785_v41, 2 }
 0x282   : > { %v795_v44 = vrot.slane %v794_v42, 2 }
 0x283   : > { %v787_v45 = vadd.f32 %v786_v43, %v785_v41 }
 0x284   : > { %v796_v46 = vadd.f32 %v795_v44, %v794_v42 }
 0x285   : > { %v788_v47 = vrot.slane %v787_v45, 1 }
 0x286   : > { %v797_v48 = vrot.slane %v796_v46, 1 }
 0x287   : > { %v789_v49 = vadd.f32 %v788_v47, %v787_v45 }
 0x288   : > { %v798_v50 = vadd.f32 %v797_v48, %v796_v46 }
 0x289   : > { %v799_v51 = vmul.f32 0.03125, %v789_v49 }
 0x28a   : > { %v800_v52 = vmul.f32 0.03125, %v798_v50 }
 0x28b   : > { %v801_v53 = vadd.f32 1e-05, %v799_v51 }
 0x28c   : > { %v802_v54 = vadd.f32 1e-05, %v800_v52 }
 0x28d   : > { %1222 = vrsqrt.f32 %v801_v53 }
 0x28e   : > { %1224 = vrsqrt.f32 %v802_v54 }
 0x297   : > { %v1223_v55 = vpop.eup %1222 }
 0x298   : > { %v1225_v56 = vpop.eup %1224  ;;  %v809_v57 = vmul.f32 %v1223_v55, %v769_v19  ;;  %v811_v58 = vmul.f32 %v1223_v55, %v771_v20  ;;  %v805_v59 = vmul.f32 %v1223_v55, %v765_v17  ;;  %v807_v63 = vmul.f32 %v1223_v55, %v767_v18 }
 0x299   : > { %v812_v60 = vmul.f32 %v1225_v56, %v772_v24  ;;  %v806_v61 = vmul.f32 %v1225_v56, %v766_v21  ;;  %v808_v62 = vmul.f32 %v1225_v56, %v768_v22  ;;  %v810_v0 = vmul.f32 %v1225_v56, %v770_v23 }
 0x29a   : > { %v817_v1 = vmax.f32 %v809_v57, 0.0  ;;  %v819_v2 = vmax.f32 %v811_v58, 0.0  ;;  %v813_v3 = vmax.f32 %v805_v59, 0.0  ;;  %v815_v4 = vmax.f32 %v807_v63, 0.0 }
 0x29b   : > { %v820_v5 = vmax.f32 %v812_v60, 0.0  ;;  %v814_v6 = vmax.f32 %v806_v61, 0.0  ;;  %v816_v7 = vmax.f32 %v808_v62, 0.0  ;;  %v818_v8 = vmax.f32 %v810_v0, 0.0 }
 0x29c   : > { %v1173_v9 = vpack.c.bf16 %v819_v2, %v817_v1  ;;  %v1169_v10 = vpack.c.bf16 %v815_v4, %v813_v3 }
 0x29d   : > { %v1167_v11 = vpack.c.bf16 %v816_v7, %v814_v6  ;;  %v1171_v12 = vpack.c.bf16 %v820_v5, %v818_v8 }
 0x29f   : > { %1168 = vmatprep.subr.bf16.mxu1 %v1167_v11 }
 0x2a0   : > { %1170 = vmatpush1.bf16.msra.mxu1 %v1169_v10 }
 0x2a1   : > { %1172 = vmatprep.subr.bf16.mxu1 %v1171_v12 }
 0x2a4   : > { %1174 = vmatpush1.bf16.msra.mxu1 %v1173_v9 }
 0x2a7   : > { %1064 = vmatmul.mubr.msk.f32.vlgmr.msra.gmra.mrb[8].mxu1 %vm643_vm2, %v821_v13 }
 0x37a   : > { %v897_v15 = vpop.f32.mrb[8].mxu1 }
 0x37b   : > { %v898_v16 = vadd.f32 %v897_v15, %v826_v14  ;;  %v899_v17 = vpop.f32.mrb[9].mxu1 }
 0x37c   : > { %v900_v18 = vadd.f32 %v899_v17, %v826_v14 }
 0x37d   : > { %v902_v19 = vrot.slane %v898_v16, 4 }
 0x37e   : > { %v908_v20 = vrot.slane %v900_v18, 4 }
 0x37f   : > { %v903_v21 = vadd.f32 %v902_v19, %v898_v16 }
 0x380   : > { %v909_v22 = vadd.f32 %v908_v20, %v900_v18 }
 0x381   : > { %v904_v23 = vrot.slane %v903_v21, 2 }
 0x382   : > { %v910_v24 = vrot.slane %v909_v22, 2 }
 0x383   : > { %v905_v25 = vadd.f32 %v904_v23, %v903_v21 }
 0x384   : > { %v911_v26 = vadd.f32 %v910_v24, %v909_v22 }
 0x385   : > { %v906_v27 = vrot.slane %v905_v25, 1 }
 0x386   : > { %v912_v28 = vrot.slane %v911_v26, 1 }
 0x387   : > { %v907_v29 = vadd.f32 %v906_v27, %v905_v25 }
 0x388   : > { %v913_v30 = vadd.f32 %v912_v28, %v911_v26 }
 0x389   : > { %v915_v31 = vmul.f32 0.125, %v907_v29 }
 0x38a   : > { %v916_v32 = vmul.f32 0.125, %v913_v30 }
 0x38b   : > { %v917_v33 = vsub.f32 %v898_v16, %v915_v31 }
 0x38c   : > { %v918_v34 = vsub.f32 %v900_v18, %v916_v32 }
 0x38d   : > { %v919_v35 = vmul.f32 %v917_v33, %v917_v33 }
 0x38e   : > { %v920_v36 = vmul.f32 %v918_v34, %v918_v34 }
 0x38f   : > { %v921_v37 = vrot.slane %v919_v35, 4 }
 0x390   : > { %v927_v38 = vrot.slane %v920_v36, 4 }
 0x391   : > { %v922_v39 = vadd.f32 %v921_v37, %v919_v35 }
 0x392   : > { %v928_v40 = vadd.f32 %v927_v38, %v920_v36 }
 0x393   : > { %v923_v41 = vrot.slane %v922_v39, 2 }
 0x394   : > { %v929_v42 = vrot.slane %v928_v40, 2 }
 0x395   : > { %v924_v43 = vadd.f32 %v923_v41, %v922_v39 }
 0x396   : > { %v930_v44 = vadd.f32 %v929_v42, %v928_v40 }
 0x397   : > { %v925_v45 = vrot.slane %v924_v43, 1 }
 0x398   : > { %v931_v46 = vrot.slane %v930_v44, 1 }
 0x399   : > { %v926_v47 = vadd.f32 %v925_v45, %v924_v43 }
 0x39a   : > { %v932_v48 = vadd.f32 %v931_v46, %v930_v44 }
 0x39b   : > { %v933_v49 = vmul.f32 0.125, %v926_v47 }
 0x39c   : > { %v934_v50 = vmul.f32 0.125, %v932_v48 }
 0x39d   : > { %v935_v51 = vadd.f32 1e-05, %v933_v49 }
 0x39e   : > { %v936_v52 = vadd.f32 1e-05, %v934_v50 }
 0x39f   : > { %1226 = vrsqrt.f32 %v935_v51 }
 0x3a0   : > { %1228 = vrsqrt.f32 %v936_v52 }
 0x3a9   : > { %v1227_v53 = vpop.eup %1226 }
 0x3aa   : > { %v1229_v54 = vpop.eup %1228  ;;  %v939_v55 = vmul.f32 %v1227_v53, %v917_v33 }
 0x3ab   : > { %v940_v56 = vmul.f32 %v1229_v54, %v918_v34 }
 0x3ac   : > { %941 = vst [vmem:[%s272_s13] sm:$0xff] %v939_v55 }
 0x3ad   : > { %942 = vst [vmem:[%s272_s13 + $0x8] sm:$0xff] %v940_v56 }
 0x3ae   : > { %1243 = shalt.err (!%p1240_p3)
}
 0x3af   : > { %s1244_s29 = scalar_lea.hbm %s1542_s19, 256  ;;  %s1248_s15 = scalar_lea.hbm %s1591_s7, 512 }
 0x3b0   : > { %p1245_p4 = scmp.ne.s32.totalorder %s1542_s19, %s1244_s29  ;;  %p1249_p9 = scmp.lt.u32.totalorder %s1542_s19, %s1591_s7 }
 0x3b1   : > { %p1250_p10 = scmp.lt.u32.totalorder %s1248_s15, %s1244_s29  ;;  %p1252_p12 = scmp.lt.u32.totalorder %s1244_s29, %s1542_s19 }
 0x3b2   : > { %p1246_p7 = pnand %p1245_p4, %p1375_p5 }
 0x3b3   : > { %p1251_p11 = por %p1250_p10, %p1249_p9 }
 0x3b4   : > { %p1247_p8 = pneg %p1246_p7 }
 0x3b5   : > { %p1253_p13 = por %p1252_p12, %p1251_p11 }
 0x3b7   : > { %p1254_p0 = pnand %p1253_p13, %p1247_p8 }
 0x3b9   : > { %1257 = shalt.err (!%p1254_p0)
}
 0x3ba   : > { %1175 = dma.vmem_to_hbm [thread:$0]  (%p1375_p5), %s1544_s16, 256, %s1542_s19, %s944_s20  }
 0x3bb PF: > { %p1181_p1 = scmp.ge.s32.totalorder %s1292_s27, 2  ;;  %s970_s17 = sand.u32 1, %s1280_s24  }
 0x3bc   : > { %s971_s18 = scalar_lea.sflag [#allocation3], %s970_s17 }
 0x3bd   : > { %p1178_p2 = pnand %p1181_p1, %p1379_p6 }
 0x3bf   : > { %1275 = dma.done.wait (!%p1178_p2), %s971_s18, 256  }
 0x3c0   : > { %1277 = vsyncadd (!%p1178_p2), %s971_s18, 4294967040  ;;  %p17_p3 = scmp.ge.s32.totalorder %s1362_s30, 4   ;;  %s1596_s24 = smov %s1284_s25 }
 0x3c1   : > { %s1597_s25 = smov %s1288_s26  ;;  %s1598_s26 = smov %s1373_s10 }
 0x3c2   : > { %s1599_s27 = smov %s1362_s30  ;;  %19 = sbr.rel (!%p17_p3) target bundleno = 3 (0x3), region = 83 }
 0x3c9   :  { %976 = vsyncpa [#allocation3], 1 }
 0x3ca   :  { %978 = vsyncpa [#allocation3 + $0x1], 1 }

</bundles_post_ra>
